<compile_context>
chip_gen: v7x
topology: tpu7x:2x2x1
jax: 0.10.0
libtpu: 0.0.40
codegen_flags: <defaults>
</compile_context>

<pallas_src>
import jax
import jax.numpy as jnp
import numpy as np
from jax.experimental import pallas as pl
from jax.experimental.pallas import tpu as pltpu


# ----------------------------------------------------------------------------
# Buffer setup (mirrors the module's __init__, done in plain JAX)
# ----------------------------------------------------------------------------
def make_omegan_list(beta: float, max_len: int = 32,
                     transform_method: str = "normalised") -> jnp.ndarray:
    transform_method_types = ["None", "standardised", "normalised",
                              "normalised-standardised"]
    if transform_method not in transform_method_types:
        raise ValueError("transform_method not found")

    matsu = jnp.pi * (1 + 2 * jnp.arange(max_len, dtype=jnp.float32)) / beta
    matsu_mean = jnp.mean(matsu)
    matsu_std = jnp.std(matsu, ddof=1)            # torch.std uses ddof=1
    standardlised_matsu = (matsu - matsu_mean) / matsu_std

    matsu_max = jnp.max(matsu)
    matsu_min = jnp.min(matsu)
    normalised_matsu = (matsu - matsu_min) / (matsu_max - matsu_min)

    matsu_normalised_mean = jnp.mean(normalised_matsu)
    matsu_normalised_std = jnp.std(normalised_matsu, ddof=1)
    # NOTE: subtracts normalised-series stats from the *raw* matsu values,
    # exactly mirroring the original PyTorch module (kept for fidelity).
    standardlised_normalised_matsu = (matsu - matsu_normalised_mean) / matsu_normalised_std

    if transform_method == "standardised":
        return standardlised_matsu
    elif transform_method == "normalised":
        return normalised_matsu
    elif transform_method == "normalised-standardised":
        return standardlised_normalised_matsu
    else:  # 'None'
        return matsu


# ----------------------------------------------------------------------------
# Generation-aware defaults and tiling
# ----------------------------------------------------------------------------
def _round_up(n: int, m: int) -> int:
    return ((n + m - 1) // m) * m


def _tpu_config():
    """(block_budget_bytes, vmem_limit_bytes, min_grid_steps) per generation."""
    kind = ""
    try:
        kind = jax.devices()[0].device_kind.lower()
    except Exception:
        pass
    if ("v5 lite" in kind) or ("v5e" in kind) or ("v5litepod" in kind):
        # single TC, 16 MiB default scoped VMEM, slow HBM hides step overhead:
        # correctness of the budget matters more than growing it.
        return 12 << 20, 16 << 20, 1
    if ("v6" in kind) or ("trillium" in kind):
        # single TC, 128 MiB physical VMEM: big blocks, no forced splitting.
        return 24 << 20, 64 << 20, 1
    if "v7" in kind:
        # 2 TCs/chip, 64 MiB physical VMEM per TC: >=2 steps per TC so the
        # pipeline overlaps, headroom kept under 64 MiB.
        return 24 << 20, 48 << 20, 4
    # unknown generation: conservative.
    return 12 << 20, 32 << 20, 2


def _choose_tiles(b: int, t: int, d: int, itemsize: int,
                  budget_bytes: int, min_steps: int):
    """Pick (bt, tt): batch tile and sequence tile.

    Per logical (batch, t) row the double-buffered VMEM footprint is
      2 * (round_up(D, 128) + round_up(D+1, 128)) * itemsize
    (in block + out block, lanes padded to 128), plus the padded PE block.
    Among configurations that fit the budget, prefer those reaching at least
    `min_steps` grid steps (pipelining / megacore), then the largest block.
    """
    lane_words = _round_up(d, 128) + _round_up(max(d + 1, 1), 128)
    row_bytes = 2 * lane_words * itemsize
    sub = 8 * max(1, 4 // itemsize)    # sublane granule: f32->8, bf16->16, i8->32

    b_tiles = [v for v in range(1, b + 1) if b % v == 0]
    t_tiles = [v for v in range(1, t + 1)
               if t % v == 0 and (v == t or v % sub == 0)]

    best_key, best = None, (1, t)
    for bt in b_tiles:
        for tt in t_tiles:
            rows = bt * tt
            block_bytes = rows * row_bytes + 2 * tt * 128 * itemsize  # + PE block
            steps = (b // bt) * (t // tt)
            fits = 1 if block_bytes <= budget_bytes else 0
            # fit first; then enough steps (credit capped at min_steps so we do
            # not over-shrink); then: biggest block if it fits, smallest if not.
            key = (fits, min(steps, min_steps), rows if fits else -rows)
            if best_key is None or key > best_key:
                best_key, best = key, (bt, tt)
    return best


# ----------------------------------------------------------------------------
# Pallas kernel: write x slab + PE column directly into the output block
# ----------------------------------------------------------------------------
def _concat_kernel(x_ref, pe_ref, o_ref):
    bt, tt, d = x_ref.shape
    # x slab -> lanes [0, d) of the output block (no in-kernel concatenate).
    o_ref[:, :, 0:d] = x_ref[...]
    # Flipped Matsubara PE column -> last lane. Broadcast is over the leading
    # (non-vreg) batch axis, i.e. the same vreg is stored bt times: ~free.
    o_ref[:, :, d:d + 1] = jnp.broadcast_to(pe_ref[...], (bt, tt, 1))


def matsubara_pe_concat(x: jnp.ndarray, omegan_list: jnp.ndarray,
                        wn_s: int, wn_e: int, *,
                        force_pallas: bool = False,
                        budget_bytes: int = None,
                        min_steps: int = None) -> jnp.ndarray:
    """Forward pass of Matsubara_PositionalEncoder_Concatenate.

    x: (B, T, D) -> out: (B, T, D+1)
    """
    b, t, d = x.shape
    if wn_e - wn_s != t:
        raise ValueError("omegan slice length must equal seq_len")
    itemsize = x.dtype.itemsize

    # torch.flip along the sequence axis; exact buffer values, shape (1, T, 1).
    # (If x is bf16 this rounds the f32 buffer to the output dtype, matching a
    # torch.cat which requires a common dtype.)
    pe = omegan_list[wn_s:wn_e][::-1].reshape(1, t, 1).astype(x.dtype)

    # Tiny problems: ~one vreg of work, masked partial-lane stores and the
    # pallas_call launch dominate -> let XLA fuse the concat into the consumer.
    if (not force_pallas
            and b * t * _round_up(d + 1, 128) * itemsize <= (128 << 10)):
        return jnp.concatenate([x, jnp.broadcast_to(pe, (b, t, 1))], axis=-1)

    cfg_budget, vmem_limit, cfg_min_steps = _tpu_config()
    if budget_bytes is None:
        budget_bytes = cfg_budget
    if min_steps is None:
        min_steps = cfg_min_steps

    bt, tt = _choose_tiles(b, t, d, itemsize, budget_bytes, min_steps)
    grid = (b // bt, t // tt)

    # Pure memory-bound custom call: tell XLA's scheduler so it can overlap.
    bytes_accessed = (b * t * d + t + b * t * (d + 1)) * itemsize

    return pl.pallas_call(
        _concat_kernel,
        out_shape=jax.ShapeDtypeStruct((b, t, d + 1), x.dtype),
        grid=grid,
        in_specs=[
            pl.BlockSpec((bt, tt, d), lambda i, j: (i, j, 0)),
            # constant batch index; resident across batch steps, tiny otherwise.
            pl.BlockSpec((1, tt, 1), lambda i, j: (0, j, 0)),
        ],
        out_specs=pl.BlockSpec((bt, tt, d + 1), lambda i, j: (i, j, 0)),
        compiler_params=pltpu.CompilerParams(
            dimension_semantics=("parallel", "parallel"),
            vmem_limit_bytes=vmem_limit),
        cost_estimate=pl.CostEstimate(flops=0, transcendentals=0,
                                      bytes_accessed=bytes_accessed),
    )(x, pe)


# ----------------------------------------------------------------------------
# Demo / self-check
# ----------------------------------------------------------------------------
if __name__ == "__main__":
    beta = 10.0
    max_len = 32
    omegan_list = make_omegan_list(beta, max_len=max_len,
                                   transform_method="normalised")

    def ref_concat(x, wn_s, wn_e):
        tt = wn_e - wn_s
        pe = omegan_list[wn_s:wn_e][::-1].reshape(1, tt, 1).astype(x.dtype)
        return jnp.concatenate(
            [x, jnp.broadcast_to(pe, (x.shape[0], tt, 1))], axis=-1)

    key = jax.random.PRNGKey(0)
    k1, k2, k3 = jax.random.split(key, 3)

    # 1) module-sized small input (force_pallas so the kernel path is used)
    B, T, D = 2, 8, 32
    wn_s, wn_e = 0, 8
    x = jax.random.normal(k1, (B, T, D), dtype=jnp.float32)
    out = jax.block_until_ready(
        matsubara_pe_concat(x, omegan_list, wn_s, wn_e, force_pallas=True))
    assert out.shape == (B, T, D + 1)
    np.testing.assert_allclose(np.asarray(out),
                               np.asarray(ref_concat(x, wn_s, wn_e)),
                               rtol=1e-6, atol=1e-6)

    # 2) multi-batch grid + D >= 128 (exercises the corrected lane accounting)
    B2, T2, D2 = 8, 16, 160
    wn_s2, wn_e2 = 4, 20
    x2 = jax.random.normal(k2, (B2, T2, D2), dtype=jnp.float32)
    out2 = jax.block_until_ready(
        matsubara_pe_concat(x2, omegan_list, wn_s2, wn_e2, force_pallas=True))
    np.testing.assert_allclose(np.asarray(out2),
                               np.asarray(ref_concat(x2, wn_s2, wn_e2)),
                               rtol=1e-6, atol=1e-6)

    # 3) force the T-tiled (2-D grid) path with a tiny budget override
    B3, T3, D3 = 4, 32, 64
    wn_s3, wn_e3 = 0, 32
    x3 = jax.random.normal(k3, (B3, T3, D3), dtype=jnp.float32)
    out3 = jax.block_until_ready(
        matsubara_pe_concat(x3, omegan_list, wn_s3, wn_e3, force_pallas=True,
                            budget_bytes=32 << 10, min_steps=4))
    np.testing.assert_allclose(np.asarray(out3),
                               np.asarray(ref_concat(x3, wn_s3, wn_e3)),
                               rtol=1e-6, atol=1e-6)

    print("KERNEL_OK")
</pallas_src>

<mosaic_0001>
module attributes {stable_mosaic.version = 11 : i64} {
  func.func @_concat_kernel(%arg0: i32, %arg1: i32, %arg2: memref<1x8x32xf32, #tpu.memory_space<vmem>>, %arg3: memref<1x8x1xf32, #tpu.memory_space<vmem>>, %arg4: memref<1x8x33xf32, #tpu.memory_space<vmem>>) attributes {dimension_semantics = [#tpu.dimension_semantics<parallel>, #tpu.dimension_semantics<parallel>], iteration_bounds = array<i64: 2, 1>, scalar_prefetch = 0 : i64, scratch_operands = 0 : i64, tpu.core_type = #tpu.core_type<tc>, window_params = [{transform_indices = @transform_0, window_bounds = array<i64: 1, 8, 32>}, {transform_indices = @transform_1, window_bounds = array<i64: 1, 8, 1>}, {transform_indices = @transform_2, window_bounds = array<i64: 1, 8, 33>}]} {
    %c0 = arith.constant 0 : index
    %c0_0 = arith.constant 0 : index
    %c0_1 = arith.constant 0 : index
    %0 = vector.load %arg2[%c0, %c0_0, %c0_1] : memref<1x8x32xf32, #tpu.memory_space<vmem>>, vector<1x8x32xf32>
    %c0_2 = arith.constant 0 : index
    %c0_3 = arith.constant 0 : index
    %c0_4 = arith.constant 0 : index
    %1 = vector.load %arg4[%c0_2, %c0_3, %c0_4] : memref<1x8x33xf32, #tpu.memory_space<vmem>>, vector<1x8x32xf32>
    tpu.vector_store %arg4[%c0_2, %c0_3, %c0_4], %0 {strides = array<i32>} : memref<1x8x33xf32, #tpu.memory_space<vmem>>, vector<1x8x32xf32>,
    %c0_5 = arith.constant 0 : index
    %c0_6 = arith.constant 0 : index
    %c0_7 = arith.constant 0 : index
    %2 = vector.load %arg3[%c0_5, %c0_6, %c0_7] : memref<1x8x1xf32, #tpu.memory_space<vmem>>, vector<1x8x1xf32>
    %c0_8 = arith.constant 0 : index
    %c0_9 = arith.constant 0 : index
    %c32 = arith.constant 32 : index
    %3 = vector.load %arg4[%c0_8, %c0_9, %c32] : memref<1x8x33xf32, #tpu.memory_space<vmem>>, vector<1x8x1xf32>
    tpu.vector_store %arg4[%c0_8, %c0_9, %c32], %2 {strides = array<i32>} : memref<1x8x33xf32, #tpu.memory_space<vmem>>, vector<1x8x1xf32>,
    return
  }
  func.func @transform_0(%arg0: i32, %arg1: i32) -> (i32, i32, i32) {
    %c0_i32 = arith.constant 0 : i32
    %c0_i32_0 = arith.constant 0 : i32
    return %arg0, %arg1, %c0_i32 : i32, i32, i32
  }
  func.func @transform_1(%arg0: i32, %arg1: i32) -> (i32, i32, i32) {
    %c0_i32 = arith.constant 0 : i32
    %c0_i32_0 = arith.constant 0 : i32
    %c0_i32_1 = arith.constant 0 : i32
    return %c0_i32, %arg1, %c0_i32_0 : i32, i32, i32
  }
  func.func @transform_2(%arg0: i32, %arg1: i32) -> (i32, i32, i32) {
    %c0_i32 = arith.constant 0 : i32
    %c0_i32_0 = arith.constant 0 : i32
    return %arg0, %arg1, %c0_i32 : i32, i32, i32
  }
}

</mosaic_0001>

<bundles_post_ra>
// kernel: tpu_custom_call.1
= control target key start
LH: loop header
LB: loop body
LE: loop exit
PB: predicated region body
PF: predicated region fallthrough
CT: control target
= control target key end

     0   :  { %7 = vsyncpa [#allocation3], 0  ;;  %s697_s0 = inlined_call_operand.hbm [shape: f32[2,8,32], index: 0, kind: input, shape index: {}]   ;;  %s698_s1 = inlined_call_operand.vmem [shape: f32[1,8,1], index: 1, kind: input, shape index: {}]   ;;  %s699_s2 = inlined_call_operand.hbm [shape: f32[2,8,33], index: 2, kind: output, shape index: {}]  }
   0x1   :  { %9 = vsyncpa [#allocation3 + $0x1], 0 }
   0x2   :  { %10 = vsyncpa [#allocation4], 0 }
   0x3   :  { %12 = vsyncpa [#allocation4 + $0x1], 0  ;;  %s522_s9 = smov 0   ;;  %s524_s10 = smov 0  }
   0x4   :  { %s526_s11 = smov 0   ;;  %s528_s12 = smov 0  }
   0x5   :  { %s530_s13 = smov 0   ;;  %s532_s14 = smov 0  }
   0x6 LB: > { %s313_s15 = sadd.s32 4294967295, %s502_s14   ;;  %s314_s16 = sadd.s32 4294967294, %s502_s14   ;;  %s502_s14 = sphi %s532_s14, %s18_s14   ;;  %s498_s13 = sphi %s530_s13, %s715_s13   ;;  %s494_s12 = sphi %s528_s12, %s714_s12   ;;  %s490_s11 = sphi %s526_s11, %s713_s11   ;;  %s486_s10 = sphi %s524_s10, %s712_s10   ;;  %s482_s9 = sphi %s522_s9, %s711_s9  }
   0x7   : > { %s30_s17 = sadd.s32 1, %s498_s13  ;;  %s39_s18 = sadd.s32 1, %s490_s11 }
   0x8   : > { %p32_p0 = scmp.ge.s32.totalorder %s30_s17, 2  ;;  %p46_p1 = scmp.ne.s32.totalorder %s490_s11, %s486_s10 }
   0x9   : > { %p47_p2 = scmp.eq.s32.totalorder %s502_s14, 0  ;;  %p52_p3 = scmp.ne.s32.totalorder %s486_s10, %s482_s9 }
   0xa   : > { %s717_s17 = smov (%p32_p0, %s30_s17), 0  ;;  %p53_p5 = scmp.eq.s32.totalorder %s313_s15, 0 }
   0xb   : > { %p563_p4 = por %p47_p2, %p46_p1  ;;  %s34_s20 = ssub.s32 %s498_s13, %s717_s17 }
   0xc   : > { %p104_p6 = scmp.eq.s32.totalorder %s313_s15, 1  ;;  %p37_p7 = scmp.eq.s32.totalorder %s34_s20, 0 }
   0xd   : > { %p569_p8 = por %p53_p5, %p52_p3  ;;  %p110_p10 = scmp.eq.s32.totalorder %s314_s16, 1 }
   0xe   : > { %p573_p9 = por %p104_p6, %p46_p1  ;;  %p339_p13 = scmp.lt.s32.totalorder %s502_s14, 2 }
   0xf   : > { %s578_s23 = scalar_select %p37_p7, %s490_s11, %s39_s18  }
  0x10   : > { %s703_s22 = scalar_select %p573_p9, 1, 0 }
  0x11   : > { %p580_p11 = por %p110_p10, %p52_p3  ;;  %s137_s25 = sand.u32 1, %s490_s11  }
  0x12   : > { %s318_s26 = sshll.u32 %s137_s25, 3  ;;  %s319_s27 = sshll.u32 %s498_s13, 7 }
  0x13   : > { %s704_s24 = scalar_select %p580_p11, 1, 0 }
  0x14   : > { %s591_s30 = scalar_lea.hbm %s697_s0, %s319_s27  ;;  %s141_s3 = scalar_lea.vmem [#allocation2], %s318_s26 }
  0x15   : > { %s149_s4 = sshll.u32 %s141_s3, 4  ;;  %p597_p0 = pnand %p339_p13, %p563_p4  ;;  %s593_s4 = int_to_ptr.vmem [resolvable:$true] %s149_s4 }
  0x16   : > { %s138_s6 = scalar_lea.sflag [#allocation3], %s137_s25  ;;  %s390_s7 = scalar_lea.hbm %s591_s30, 128 }
  0x17   : > { %p391_p3 = scmp.ne.s32.totalorder %s591_s30, %s390_s7  ;;  %p392_p5 = pneg %p597_p0 }
  0x18   : > { %s395_s16 = scalar_lea.hbm %s697_s0, 256  ;;  %p396_p4 = scmp.lt.u32.totalorder %s591_s30, %s697_s0 }
  0x19   : > { %p393_p6 = pnand %p392_p5, %p391_p3  ;;  %p397_p10 = scmp.lt.u32.totalorder %s395_s16, %s390_s7 }
  0x1a   : > { %p399_p12 = scmp.lt.u32.totalorder %s390_s7, %s591_s30 }
  0x1b   : > { %p394_p7 = pneg %p393_p6  ;;  %p398_p13 = por %p397_p10, %p396_p4 }
  0x1d   : > { %p400_p1 = por %p399_p12, %p398_p13 }
  0x1f   : > { %p401_p2 = pnand %p400_p1, %p394_p7 }
  0x21   : > { %404 = shalt.err (!%p401_p2)
}
  0x22   : > { %s405_s20 = scalar_lea.vmem %s593_s4, 128  ;;  %s504_s25 = smov [#allocation2]  }
  0x23   : > { %p406_p3 = scmp.ne.s32.totalorder %s593_s4, %s405_s20  ;;  %s410_s26 = sshll.u32 %s504_s25, 4  ;;  %s411_s26 = int_to_ptr.vmem [resolvable:$false] %s410_s26 }
  0x24   : > { %s412_s27 = scalar_lea.vmem %s411_s26, 256  ;;  %p413_p9 = scmp.lt.s32.totalorder %s593_s4, %s411_s26 }
  0x25   : > { %p408_p6 = pnand %p406_p3, %p392_p5  ;;  %p414_p4 = scmp.lt.s32.totalorder %s412_s27, %s405_s20 }
  0x27   : > { %p409_p11 = pneg %p408_p6  ;;  %p415_p10 = por %p414_p4, %p413_p9 }
  0x29   : > { %p416_p12 = pnand %p415_p10, %p409_p11 }
  0x2b   : > { %419 = shalt.err (!%p416_p12)
}
  0x2c   : > { %334 = dma.hbm_to_vmem [thread:$0]  (!%p597_p0), %s591_s30, 128, %s593_s4, %s138_s6  }
  0x2d   : > { %p706_p1 = scmp.lt.s32.totalorder %s502_s14, 3  ;;  %p707_p2 = scmp.ge.s32.totalorder %s502_s14, 1 }
  0x2f   : > { %p155_p5 = pnand %p707_p2, %p706_p1 }
  0x30   : > { %s633_s28 = sand.u32 (!%p155_p5), 1, %s486_s10  }
  0x31   : > { %158 = sbr.rel (%p155_p5) target bundleno = 188 (0xbc), region = 28  ;;  %s321_s29 = sshll.u32 (!%p155_p5), %s633_s28, 3 }
  0x32   : > { %s161_s3 = scalar_lea.sflag (!%p155_p5), [#allocation3], %s633_s28  ;;  %s164_s7 = scalar_lea.vmem (!%p155_p5), [#allocation2], %s321_s29 }
  0x38   : > { %473 = dma.done.wait (%p569_p8), %s161_s3, 128  }
  0x39   : > { %475 = vsyncadd (%p569_p8), %s161_s3, 4294967168  ;;  %vm194_vm0 = vcmask 261120   ;;  %v193_v0 = vld [vmem:[%s164_s7] sm:$0xff]  ;;  %s188_s5 = scalar_lea.vmem [#allocation5], %s321_s29  ;;  %s505_s6 = smov 32   ;;  %vm201_vm1 = vcmask 269568  }
  0x3a   : > { %v196_v1 = vld [vmem:[%s698_s1] sm:$0xff]  ;;  %195 = vst.msk [vmem:[%s188_s5] sm:$0xff] %vm194_vm0, %v193_v0  ;;  %s324_s8 = sshll.u32 %s494_s12, 7  ;;  %s218_s15 = sshll.u32 %s188_s5, 4  ;;  %s650_s15 = int_to_ptr.vmem [resolvable:$true] %s218_s15 }
  0x3b   : > { %198 = vrot.lane.b32.xlu0 %v196_v1, %s505_s6  ;;  %s648_s21 = scalar_lea.hbm %s699_s2, %s324_s8  ;;  %s204_s19 = scalar_lea.sflag [#allocation4], %s633_s28 }
  0x3c   : > { %s420_s20 = scalar_lea.vmem %s650_s15, 128  ;;  %p708_p9 = scmp.ne.s32.totalorder %s703_s22, 0 }
  0x3d   : > { %p421_p8 = scmp.ne.s32.totalorder %s650_s15, %s420_s20  ;;  %s506_s12 = smov [#allocation5]  }
  0x3e   : > { %s424_s25 = sshll.u32 %s506_s12, 4  ;;  %s425_s25 = int_to_ptr.vmem [resolvable:$false] %s424_s25 }
  0x3f   : > { %p422_p11 = pnand %p421_p8, %p708_p9  ;;  %s426_s26 = scalar_lea.vmem %s425_s25, 256 }
  0x40   : > { %p427_p7 = scmp.lt.s32.totalorder %s650_s15, %s425_s25  ;;  %p428_p13 = scmp.lt.s32.totalorder %s426_s26, %s420_s20 }
  0x41   : > { %p423_p0 = pneg %p422_p11 }
  0x42   : > { %p429_p3 = por %p428_p13, %p427_p7 }
  0x44   : > { %p430_p6 = pnand %p429_p3, %p423_p0 }
  0xad   : > { %v199_v2 = vpop.permute.xlu0 %198 }
  0xae   : > { %202 = vst.msk [vmem:[%s188_s5] sm:$0xff] %vm201_vm1, %v199_v2 }
  0xaf   : > { %433 = shalt.err (!%p430_p6)
}
  0xb0   : > { %s434_s27 = scalar_lea.hbm %s648_s21, 128  ;;  %s438_s3 = scalar_lea.hbm %s699_s2, 256 }
  0xb1   : > { %p435_p4 = scmp.ne.s32.totalorder %s648_s21, %s434_s27  ;;  %p439_p1 = scmp.lt.u32.totalorder %s648_s21, %s699_s2 }
  0xb2   : > { %p440_p2 = scmp.lt.u32.totalorder %s438_s3, %s434_s27  ;;  %p442_p8 = scmp.lt.u32.totalorder %s434_s27, %s648_s21 }
  0xb3   : > { %p436_p10 = pnand %p435_p4, %p708_p9 }
  0xb4   : > { %p441_p5 = por %p440_p2, %p439_p1 }
  0xb5   : > { %p437_p12 = pneg %p436_p10 }
  0xb6   : > { %p443_p11 = por %p442_p8, %p441_p5 }
  0xb8   : > { %p444_p0 = pnand %p443_p11, %p437_p12 }
  0xba   : > { %447 = shalt.err (!%p444_p0)
}
  0xbb   : > { %329 = dma.vmem_to_hbm [thread:$0]  (%p708_p9), %s650_s15, 128, %s648_s21, %s204_s19  }
  0xbc PF: > { %s230_s4 = sand.u32 1, %s482_s9   ;;  %p709_p7 = scmp.ne.s32.totalorder %s704_s24, 0 }
  0xbd   : > { %p710_p13 = scmp.ge.s32.totalorder %s502_s14, 2  ;;  %s231_s5 = scalar_lea.sflag [#allocation4], %s230_s4 }
  0xbf   : > { %p336_p3 = pnand %p710_p13, %p709_p7 }
  0xc1   : > { %477 = dma.done.wait (!%p336_p3), %s231_s5, 128  }
  0xc2   : > { %479 = vsyncadd (!%p336_p3), %s231_s5, 4294967168  ;;  %s18_s14 = sadd.s32 1, %s502_s14   ;;  %s711_s9 = smov %s486_s10 }
  0xc3   : > { %p15_p6 = scmp.ge.s32.totalorder %s18_s14, 4   ;;  %s712_s10 = smov %s490_s11 }
  0xc4   : > { %s713_s11 = smov %s578_s23  ;;  %s714_s12 = smov %s498_s13 }
  0xc5   : > { %s715_s13 = smov %s717_s17  ;;  %17 = sbr.rel (!%p15_p6) target bundleno = 6 (0x6), region = 76 }
  0xcc   :  { %236 = vsyncpa [#allocation3], 1 }
  0xcd   :  { %238 = vsyncpa [#allocation3 + $0x1], 1 }
  0xce   :  { %239 = vsyncpa [#allocation4], 1 }
  0xcf   :  { %241 = vsyncpa [#allocation4 + $0x1], 1 }

</bundles_post_ra>
